<compile_context>
chip_gen: v7x
topology: tpu7x:2x2x1
jax: 0.10.0
libtpu: 0.0.40
codegen_flags: <defaults>
</compile_context>

<pallas_src>
import functools

import jax
import jax.numpy as jnp
from jax.experimental import pallas as pl
from jax.experimental.pallas import tpu as pltpu


def _round_up(x, m):
    return ((x + m - 1) // m) * m


def _l2_normalize(x, eps=1e-12):
    # Matches torch.nn.functional.normalize(x, p=2, dim=1, eps=1e-12):
    #   x / max(||x||, eps)  ==  x * rsqrt(max(||x||^2, eps^2))
    sumsq = jnp.sum(x * x, axis=1, keepdims=True)
    return x * jax.lax.rsqrt(jnp.maximum(sumsq, eps * eps))


def _fused_kernel(x_ref, wem_ref, bem_ref, wd_ref, bd_ref,
                  xn_ref, e1_ref, e2_ref, lat_ref, rec_ref, *, latent_dim):
    Lp = latent_dim  # 128-aligned latent dim

    x = x_ref[...].astype(jnp.float32)
    xn = _l2_normalize(x)                       # F.normalize(input, dim=1)
    xn_ref[...] = xn

    # Fused shared_encoder + micro_encoder: single MXU dot over the (Dp, 2Lp)
    # weight, then a lane-aligned column split (Lp is a multiple of 128).
    e12 = jnp.dot(xn, wem_ref[...], preferred_element_type=jnp.float32) + bem_ref[...]
    e1 = e12[:, :Lp]
    e2 = e12[:, Lp:]
    e1_ref[...] = e1
    e2_ref[...] = e2

    # mean of stacked embeddings, then normalize
    latn = _l2_normalize(0.5 * (e1 + e2))
    lat_ref[...] = latn

    # shared_decoder(latent) : Linear, then normalize
    rec = jnp.dot(latn, wd_ref[...], preferred_element_type=jnp.float32) + bd_ref[...]
    rec_ref[...] = _l2_normalize(rec)


def prepare_params(w_enc, b_enc, w_mic, b_mic, w_dec, b_dec):
    """Fuse + 128-pad the Linear parameters ONCE (hoisted out of the forward path).

    w_enc/w_mic: (D, L); b_enc/b_mic: (1, L); w_dec: (L, D); b_dec: (1, D).
    Zero padding is semantically inert: padded x columns are zero, padded
    embedding columns come out zero (zero weight cols + zero bias), so none of
    the row-wise L2 norms or the decoder matmul change.
    """
    D, L = w_enc.shape
    Dp = _round_up(D, 128)
    Lp = _round_up(L, 128)

    def pad2(a, rows, cols):
        a = a.astype(jnp.float32)
        return jnp.pad(a, ((0, rows - a.shape[0]), (0, cols - a.shape[1])))

    w_em = jnp.concatenate([pad2(w_enc, Dp, Lp), pad2(w_mic, Dp, Lp)], axis=1)  # (Dp, 2Lp)
    b_em = jnp.concatenate([pad2(b_enc, 1, Lp), pad2(b_mic, 1, Lp)], axis=1)    # (1, 2Lp)
    w_d = pad2(w_dec, Lp, Dp)                                                   # (Lp, Dp)
    b_d = pad2(b_dec, 1, Dp)                                                    # (1, Dp)
    return dict(w_em=w_em, b_em=b_em, w_dec=w_d, b_dec=b_d, D=D, L=L, Dp=Dp, Lp=Lp)


def _choose_tm(B, Dp, Lp, budget_bytes=28 << 20):
    """Largest batch tile that fits the VMEM budget; prefers >=2 grid blocks (v7x)."""
    # Single-buffered resident weights/biases.
    resident = 4 * (Dp * 2 * Lp + Lp * Dp + 2 * Lp + Dp)
    # Streamed per-row bytes: x block + 5 output blocks, double-buffered,
    # plus in-kernel f32 temporaries (e12, xn, latn, rec, ...).
    per_row = 4 * (3 * Dp + 3 * Lp) * 2 + 4 * (3 * Dp + 5 * Lp)
    avail = max(budget_bytes - resident, per_row * 8)
    tm_cap = max(8, (avail // per_row) // 8 * 8)
    tm_cap = min(tm_cap, 512)
    # >= 2 blocks when the batch allows it, so "parallel" shards across 2 TCs.
    if B > 8:
        target = _round_up(max(pl.cdiv(B, 2), 8), 8)
    else:
        target = _round_up(B, 8)
    tm = max(8, min(tm_cap, target, _round_up(B, 8)))
    vmem_est = resident + tm * per_row
    return tm, resident, per_row, vmem_est


def model_forward(x, params, *, tm=None):
    """x: (B, D) activations; params: output of prepare_params()."""
    B, D = x.shape
    Dp, Lp, L = params["Dp"], params["Lp"], params["L"]
    assert D == params["D"], "feature dim mismatch with prepared params"

    x = x.astype(jnp.float32)
    if Dp != D:
        # Only when the feature dim is not 128-aligned (one pad copy; keeps all
        # block loads/stores full-lane). Outputs are sliced back below.
        x = jnp.pad(x, ((0, 0), (0, Dp - D)))

    if tm is None:
        tm, _, _, vmem_est = _choose_tm(B, Dp, Lp)
    else:
        _, _, _, vmem_est = _choose_tm(B, Dp, Lp)
        tm = max(8, _round_up(min(tm, B if B >= 8 else 8), 8))
    n_blk = pl.cdiv(B, tm)
    vmem_limit = int(min(56 << 20, max(32 << 20, vmem_est * 3 // 2)))

    kernel = functools.partial(_fused_kernel, latent_dim=Lp)

    out_shapes = (
        jax.ShapeDtypeStruct((B, Dp), jnp.float32),  # normalized input
        jax.ShapeDtypeStruct((B, Lp), jnp.float32),  # embedding
        jax.ShapeDtypeStruct((B, Lp), jnp.float32),  # embedding2
        jax.ShapeDtypeStruct((B, Lp), jnp.float32),  # latent (normalized)
        jax.ShapeDtypeStruct((B, Dp), jnp.float32),  # recon (normalized)
    )

    # Weights/biases: un-blocked, single-buffered, resident in VMEM for the
    # whole grid. Activations: streamed batch blocks (double-buffered by Pallas).
    w_spec = pl.BlockSpec(memory_space=pltpu.MemorySpace.VMEM)
    row_spec = lambda cols: pl.BlockSpec((tm, cols), lambda i: (i, 0))

    outs = pl.pallas_call(
        kernel,
        out_shape=out_shapes,
        grid=(n_blk,),
        in_specs=[
            row_spec(Dp),   # x block
            w_spec,         # fused encoder weight (Dp, 2Lp)
            w_spec,         # fused encoder bias   (1, 2Lp)
            w_spec,         # decoder weight       (Lp, Dp)
            w_spec,         # decoder bias         (1, Dp)
        ],
        out_specs=(
            row_spec(Dp),   # normalized input
            row_spec(Lp),   # embedding
            row_spec(Lp),   # embedding2
            row_spec(Lp),   # latent
            row_spec(Dp),   # recon
        ),
        compiler_params=pltpu.CompilerParams(
            dimension_semantics=("parallel",),
            vmem_limit_bytes=vmem_limit,
        ),
    )(x, params["w_em"], params["b_em"], params["w_dec"], params["b_dec"])

    xn, e1, e2, lat, rec = outs
    if Dp != D:
        xn, rec = xn[:, :D], rec[:, :D]
    if Lp != L:
        e1, e2, lat = e1[:, :L], e2[:, :L], lat[:, :L]
    return xn, e1, e2, lat, rec


def _reference(x, w_enc, b_enc, w_mic, b_mic, w_dec, b_dec):
    def norm(v, eps=1e-12):
        n = jnp.sqrt(jnp.sum(v * v, axis=1, keepdims=True))
        return v / jnp.maximum(n, eps)
    xn = norm(x)
    e1 = xn @ w_enc + b_enc
    e2 = xn @ w_mic + b_mic
    latn = norm(0.5 * (e1 + e2))
    rec = norm(latn @ w_dec + b_dec)
    return xn, e1, e2, latn, rec


if __name__ == "__main__":
    B, D_IN, LATENT = 8, 256, 128

    key = jax.random.PRNGKey(0)
    kx, k1, k2, k3, k4, k5, k6 = jax.random.split(key, 7)

    x = jax.random.normal(kx, (B, D_IN), dtype=jnp.float32)

    # Deterministic parameter init (synthetic Linear weights)
    w_enc = jax.random.normal(k1, (D_IN, LATENT), dtype=jnp.float32) * 0.05
    b_enc = jax.random.normal(k2, (1, LATENT), dtype=jnp.float32) * 0.01
    w_mic = jax.random.normal(k3, (D_IN, LATENT), dtype=jnp.float32) * 0.05
    b_mic = jax.random.normal(k4, (1, LATENT), dtype=jnp.float32) * 0.01
    w_dec = jax.random.normal(k5, (LATENT, D_IN), dtype=jnp.float32) * 0.05
    b_dec = jax.random.normal(k6, (1, D_IN), dtype=jnp.float32) * 0.01

    params = prepare_params(w_enc, b_enc, w_mic, b_mic, w_dec, b_dec)  # once
    outs = model_forward(x, params)
    outs = jax.block_until_ready(outs)

    refs = _reference(x, w_enc, b_enc, w_mic, b_mic, w_dec, b_dec)
    for o, r in zip(outs, refs):
        assert o.shape == r.shape, (o.shape, r.shape)
        err = jnp.max(jnp.abs(o - r))
        assert err < 1e-4, err

    print("KERNEL_OK")
</pallas_src>

<mosaic_0001>
module attributes {stable_mosaic.version = 11 : i64} {
  func.func @_fused_kernel(%arg0: i32, %arg1: memref<8x256xf32, #tpu.memory_space<vmem>>, %arg2: memref<256x256xf32, #tpu.memory_space<vmem>>, %arg3: memref<1x256xf32, #tpu.memory_space<vmem>>, %arg4: memref<128x256xf32, #tpu.memory_space<vmem>>, %arg5: memref<1x256xf32, #tpu.memory_space<vmem>>, %arg6: memref<8x256xf32, #tpu.memory_space<vmem>>, %arg7: memref<8x128xf32, #tpu.memory_space<vmem>>, %arg8: memref<8x128xf32, #tpu.memory_space<vmem>>, %arg9: memref<8x128xf32, #tpu.memory_space<vmem>>, %arg10: memref<8x256xf32, #tpu.memory_space<vmem>>) attributes {dimension_semantics = [#tpu.dimension_semantics<parallel>], iteration_bounds = array<i64: 1>, scalar_prefetch = 0 : i64, scratch_operands = 0 : i64, tpu.core_type = #tpu.core_type<tc>, window_params = [{transform_indices = @transform_0, window_bounds = array<i64: 8, 256>}, {pipeline_mode = #tpu.pipeline_mode<synchronous>, transform_indices = @transform_1, window_bounds = array<i64: 256, 256>}, {pipeline_mode = #tpu.pipeline_mode<synchronous>, transform_indices = @transform_2, window_bounds = array<i64: 1, 256>}, {pipeline_mode = #tpu.pipeline_mode<synchronous>, transform_indices = @transform_3, window_bounds = array<i64: 128, 256>}, {pipeline_mode = #tpu.pipeline_mode<synchronous>, transform_indices = @transform_4, window_bounds = array<i64: 1, 256>}, {transform_indices = @transform_5, window_bounds = array<i64: 8, 256>}, {transform_indices = @transform_6, window_bounds = array<i64: 8, 128>}, {transform_indices = @transform_7, window_bounds = array<i64: 8, 128>}, {transform_indices = @transform_8, window_bounds = array<i64: 8, 128>}, {transform_indices = @transform_9, window_bounds = array<i64: 8, 256>}]} {
    %c0 = arith.constant 0 : index
    %c0_0 = arith.constant 0 : index
    %0 = vector.load %arg1[%c0, %c0_0] : memref<8x256xf32, #tpu.memory_space<vmem>>, vector<8x256xf32>
    %1 = arith.mulf %0, %0 : vector<8x256xf32>
    %cst = arith.constant dense<0.000000e+00> : vector<8xf32>
    %2 = vector.multi_reduction <add>, %1, %cst [1] : vector<8x256xf32> to vector<8xf32>
    %3 = vector.shape_cast %2 : vector<8xf32> to vector<8x1xf32>
    %cst_1 = arith.constant 1.000000e-24 : f32
    %4 = vector.broadcast %cst_1 : f32 to vector<8x1xf32>
    %5 = arith.maximumf %3, %4 : vector<8x1xf32>
    %6 = math.rsqrt %5 : vector<8x1xf32>
    %7 = vector.broadcast %6 : vector<8x1xf32> to vector<8x256xf32>
    %8 = arith.mulf %0, %7 : vector<8x256xf32>
    %c0_2 = arith.constant 0 : index
    %c0_3 = arith.constant 0 : index
    %9 = vector.load %arg6[%c0_2, %c0_3] : memref<8x256xf32, #tpu.memory_space<vmem>>, vector<8x256xf32>
    tpu.vector_store %arg6[%c0_2, %c0_3], %8 {strides = array<i32>} : memref<8x256xf32, #tpu.memory_space<vmem>>, vector<8x256xf32>,
    %c0_4 = arith.constant 0 : index
    %c0_5 = arith.constant 0 : index
    %10 = vector.load %arg2[%c0_4, %c0_5] : memref<256x256xf32, #tpu.memory_space<vmem>>, vector<256x256xf32>
    %cst_6 = arith.constant dense<0.000000e+00> : vector<8x256xf32>
    %11 = tpu.matmul %8, %10, %cst_6 {dimension_numbers = #tpu.dot_dimension_numbers<[1], [0], [0], [1], [0, 0, 1, 1], [], []>} : vector<8x256xf32>, vector<256x256xf32>, vector<8x256xf32> -> vector<8x256xf32>
    %c0_7 = arith.constant 0 : index
    %c0_8 = arith.constant 0 : index
    %12 = vector.load %arg3[%c0_7, %c0_8] : memref<1x256xf32, #tpu.memory_space<vmem>>, vector<1x256xf32>
    %13 = vector.broadcast %12 : vector<1x256xf32> to vector<8x256xf32>
    %14 = arith.addf %11, %13 : vector<8x256xf32>
    %15 = vector.extract_strided_slice %14 {offsets = [0, 0], sizes = [8, 128], strides = [1, 1]} : vector<8x256xf32> to vector<8x128xf32>
    %16 = vector.extract_strided_slice %14 {offsets = [0, 128], sizes = [8, 128], strides = [1, 1]} : vector<8x256xf32> to vector<8x128xf32>
    %c0_9 = arith.constant 0 : index
    %c0_10 = arith.constant 0 : index
    %17 = vector.load %arg7[%c0_9, %c0_10] : memref<8x128xf32, #tpu.memory_space<vmem>>, vector<8x128xf32>
    tpu.vector_store %arg7[%c0_9, %c0_10], %15 {strides = array<i32>} : memref<8x128xf32, #tpu.memory_space<vmem>>, vector<8x128xf32>,
    %c0_11 = arith.constant 0 : index
    %c0_12 = arith.constant 0 : index
    %18 = vector.load %arg8[%c0_11, %c0_12] : memref<8x128xf32, #tpu.memory_space<vmem>>, vector<8x128xf32>
    tpu.vector_store %arg8[%c0_11, %c0_12], %16 {strides = array<i32>} : memref<8x128xf32, #tpu.memory_space<vmem>>, vector<8x128xf32>,
    %19 = arith.addf %15, %16 : vector<8x128xf32>
    %cst_13 = arith.constant 5.000000e-01 : f32
    %20 = vector.broadcast %cst_13 : f32 to vector<8x128xf32>
    %21 = arith.mulf %20, %19 : vector<8x128xf32>
    %22 = arith.mulf %21, %21 : vector<8x128xf32>
    %cst_14 = arith.constant dense<0.000000e+00> : vector<8xf32>
    %23 = vector.multi_reduction <add>, %22, %cst_14 [1] : vector<8x128xf32> to vector<8xf32>
    %24 = vector.shape_cast %23 : vector<8xf32> to vector<8x1xf32>
    %cst_15 = arith.constant 1.000000e-24 : f32
    %25 = vector.broadcast %cst_15 : f32 to vector<8x1xf32>
    %26 = arith.maximumf %24, %25 : vector<8x1xf32>
    %27 = math.rsqrt %26 : vector<8x1xf32>
    %28 = vector.broadcast %27 : vector<8x1xf32> to vector<8x128xf32>
    %29 = arith.mulf %21, %28 : vector<8x128xf32>
    %c0_16 = arith.constant 0 : index
    %c0_17 = arith.constant 0 : index
    %30 = vector.load %arg9[%c0_16, %c0_17] : memref<8x128xf32, #tpu.memory_space<vmem>>, vector<8x128xf32>
    tpu.vector_store %arg9[%c0_16, %c0_17], %29 {strides = array<i32>} : memref<8x128xf32, #tpu.memory_space<vmem>>, vector<8x128xf32>,
    %c0_18 = arith.constant 0 : index
    %c0_19 = arith.constant 0 : index
    %31 = vector.load %arg4[%c0_18, %c0_19] : memref<128x256xf32, #tpu.memory_space<vmem>>, vector<128x256xf32>
    %cst_20 = arith.constant dense<0.000000e+00> : vector<8x256xf32>
    %32 = tpu.matmul %29, %31, %cst_20 {dimension_numbers = #tpu.dot_dimension_numbers<[1], [0], [0], [1], [0, 0, 1, 1], [], []>} : vector<8x128xf32>, vector<128x256xf32>, vector<8x256xf32> -> vector<8x256xf32>
    %c0_21 = arith.constant 0 : index
    %c0_22 = arith.constant 0 : index
    %33 = vector.load %arg5[%c0_21, %c0_22] : memref<1x256xf32, #tpu.memory_space<vmem>>, vector<1x256xf32>
    %34 = vector.broadcast %33 : vector<1x256xf32> to vector<8x256xf32>
    %35 = arith.addf %32, %34 : vector<8x256xf32>
    %36 = arith.mulf %35, %35 : vector<8x256xf32>
    %cst_23 = arith.constant dense<0.000000e+00> : vector<8xf32>
    %37 = vector.multi_reduction <add>, %36, %cst_23 [1] : vector<8x256xf32> to vector<8xf32>
    %38 = vector.shape_cast %37 : vector<8xf32> to vector<8x1xf32>
    %cst_24 = arith.constant 1.000000e-24 : f32
    %39 = vector.broadcast %cst_24 : f32 to vector<8x1xf32>
    %40 = arith.maximumf %38, %39 : vector<8x1xf32>
    %41 = math.rsqrt %40 : vector<8x1xf32>
    %42 = vector.broadcast %41 : vector<8x1xf32> to vector<8x256xf32>
    %43 = arith.mulf %35, %42 : vector<8x256xf32>
    %c0_25 = arith.constant 0 : index
    %c0_26 = arith.constant 0 : index
    %44 = vector.load %arg10[%c0_25, %c0_26] : memref<8x256xf32, #tpu.memory_space<vmem>>, vector<8x256xf32>
    tpu.vector_store %arg10[%c0_25, %c0_26], %43 {strides = array<i32>} : memref<8x256xf32, #tpu.memory_space<vmem>>, vector<8x256xf32>,
    return
  }
  func.func @transform_0(%arg0: i32) -> (i32, i32) {
    %c0_i32 = arith.constant 0 : i32
    %c0_i32_0 = arith.constant 0 : i32
    return %arg0, %c0_i32 : i32, i32
  }
  func.func @transform_1(%arg0: i32) -> (i32, i32) {
    %c0_i32 = arith.constant 0 : i32
    %c0_i32_0 = arith.constant 0 : i32
    %c0_i32_1 = arith.constant 0 : i32
    return %c0_i32, %c0_i32_0 : i32, i32
  }
  func.func @transform_2(%arg0: i32) -> (i32, i32) {
    %c0_i32 = arith.constant 0 : i32
    %c0_i32_0 = arith.constant 0 : i32
    %c0_i32_1 = arith.constant 0 : i32
    return %c0_i32, %c0_i32_0 : i32, i32
  }
  func.func @transform_3(%arg0: i32) -> (i32, i32) {
    %c0_i32 = arith.constant 0 : i32
    %c0_i32_0 = arith.constant 0 : i32
    %c0_i32_1 = arith.constant 0 : i32
    return %c0_i32, %c0_i32_0 : i32, i32
  }
  func.func @transform_4(%arg0: i32) -> (i32, i32) {
    %c0_i32 = arith.constant 0 : i32
    %c0_i32_0 = arith.constant 0 : i32
    %c0_i32_1 = arith.constant 0 : i32
    return %c0_i32, %c0_i32_0 : i32, i32
  }
  func.func @transform_5(%arg0: i32) -> (i32, i32) {
    %c0_i32 = arith.constant 0 : i32
    %c0_i32_0 = arith.constant 0 : i32
    return %arg0, %c0_i32 : i32, i32
  }
  func.func @transform_6(%arg0: i32) -> (i32, i32) {
    %c0_i32 = arith.constant 0 : i32
    %c0_i32_0 = arith.constant 0 : i32
    return %arg0, %c0_i32 : i32, i32
  }
  func.func @transform_7(%arg0: i32) -> (i32, i32) {
    %c0_i32 = arith.constant 0 : i32
    %c0_i32_0 = arith.constant 0 : i32
    return %arg0, %c0_i32 : i32, i32
  }
  func.func @transform_8(%arg0: i32) -> (i32, i32) {
    %c0_i32 = arith.constant 0 : i32
    %c0_i32_0 = arith.constant 0 : i32
    return %arg0, %c0_i32 : i32, i32
  }
  func.func @transform_9(%arg0: i32) -> (i32, i32) {
    %c0_i32 = arith.constant 0 : i32
    %c0_i32_0 = arith.constant 0 : i32
    return %arg0, %c0_i32 : i32, i32
  }
}

</mosaic_0001>

<bundles_post_ra>
// kernel: tpu_custom_call.1
= control target key start
LH: loop header
LB: loop body
LE: loop exit
PB: predicated region body
PF: predicated region fallthrough
CT: control target
= control target key end

     0   :  { %15 = vsyncpa [#allocation3], 0  ;;  %s922_s0 = inlined_call_operand.hbm [shape: f32[8,256], index: 0, kind: input, shape index: {}]   ;;  %s923_s1 = inlined_call_operand.hbm [shape: f32[256,256], index: 1, kind: input, shape index: {}]   ;;  %s924_s2 = inlined_call_operand.vmem [shape: f32[1,256], index: 2, kind: input, shape index: {}]   ;;  %s925_s3 = inlined_call_operand.hbm [shape: f32[128,256], index: 3, kind: input, shape index: {}]   ;;  %s926_s4 = inlined_call_operand.vmem [shape: f32[1,256], index: 4, kind: input, shape index: {}]   ;;  %s927_s5 = inlined_call_operand.hbm [shape: f32[8,256], index: 5, kind: output, shape index: {0}]   ;;  %s928_s6 = inlined_call_operand.hbm [shape: f32[8,128], index: 6, kind: output, shape index: {1}]   ;;  %s929_s7 = inlined_call_operand.hbm [shape: f32[8,128], index: 7, kind: output, shape index: {2}]   ;;  %s930_s8 = inlined_call_operand.hbm [shape: f32[8,128], index: 8, kind: output, shape index: {3}]   ;;  %s931_s9 = inlined_call_operand.hbm [shape: f32[8,256], index: 9, kind: output, shape index: {4}]  }
   0x1   :  { %16 = vsyncpa [#allocation6], 0 }
   0x2   :  { %17 = vsyncpa [#allocation4], 0 }
   0x3   :  { %18 = vsyncpa [#allocation10], 0 }
   0x4   :  { %19 = vsyncpa [#allocation13], 0  ;;  %s733_s30 = smov [#allocation5]   ;;  %s547_s13 = scalar_lea.hbm %s923_s1, 8192 }
   0x5   :  { %s35_s10 = sshll.u32 %s733_s30, 4  ;;  %p548_p0 = scmp.ne.s32.totalorder %s923_s1, %s547_s13  ;;  %s36_s10 = int_to_ptr.vmem [resolvable:$true] %s35_s10 }
   0x6   :  { %p551_p1 = scmp.lt.u32.totalorder %s547_s13, %s923_s1 }
   0x8   :  { %p553_p2 = pnand %p551_p1, %p548_p0 }
   0xa   :  { %556 = shalt.err (!%p553_p2)
}
   0xb   :  { %s557_s18 = scalar_lea.vmem %s36_s10, 8192  ;;  %p562_p4 = scmp.lt.s32.totalorder %s36_s10, %s36_s10 }
   0xc   :  { %p558_p3 = scmp.ne.s32.totalorder %s36_s10, %s557_s18  ;;  %p563_p5 = scmp.lt.s32.totalorder %s557_s18, %s557_s18 }
   0xe   :  { %p564_p6 = por %p563_p5, %p562_p4 }
  0x10   :  { %p565_p7 = pnand %p564_p6, %p558_p3 }
  0x12   :  { %568 = shalt.err (!%p565_p7)
}
  0x13   :  { %s734_s19 = smov 256   ;;  %s735_s20 = smov 16  }
  0x14   :  { %41 = dma.hbm_to_vmem [thread:$0]  %s923_s1, 8192, %s36_s10, [#allocation6], %s734_s19, %s734_s19, %s735_s20  }
  0x15   :  { %s736_s23 = smov [#allocation2]   ;;  %s737_s25 = smov [#allocation7]  }
  0x16   :  { %s26_s24 = sshll.u32 %s736_s23, 4  ;;  %s49_s26 = sshll.u32 %s737_s25, 4  ;;  %s27_s24 = int_to_ptr.vmem [resolvable:$true] %s26_s24  ;;  %s50_s26 = int_to_ptr.vmem [resolvable:$true] %s49_s26 }
  0x17   :  { %s569_s29 = scalar_lea.hbm %s922_s0, 256 }
  0x18   :  { %p570_p8 = scmp.ne.s32.totalorder %s922_s0, %s569_s29  ;;  %p573_p9 = scmp.lt.u32.totalorder %s569_s29, %s922_s0 }
  0x1a   :  { %p575_p10 = pnand %p573_p9, %p570_p8 }
  0x1c   :  { %578 = shalt.err (!%p575_p10)
}
  0x1d   :  { %s579_s1 = scalar_lea.vmem %s27_s24, 256  ;;  %p584_p12 = scmp.lt.s32.totalorder %s27_s24, %s27_s24 }
  0x1e   :  { %p580_p11 = scmp.ne.s32.totalorder %s27_s24, %s579_s1  ;;  %p585_p13 = scmp.lt.s32.totalorder %s579_s1, %s579_s1 }
  0x20   :  { %p586_p0 = por %p585_p13, %p584_p12 }
  0x22   :  { %p587_p1 = pnand %p586_p0, %p580_p11 }
  0x24   :  { %590 = shalt.err (!%p587_p1)
}
  0x25   :  { %29 = dma.hbm_to_vmem [thread:$0]  %s922_s0, 256, %s27_s24, [#allocation3]  }
  0x26   :  { %s591_s17 = scalar_lea.hbm %s925_s3, 4096 }
  0x27   :  { %p592_p2 = scmp.ne.s32.totalorder %s925_s3, %s591_s17  ;;  %p595_p3 = scmp.lt.u32.totalorder %s591_s17, %s925_s3 }
  0x29   :  { %p597_p4 = pnand %p595_p3, %p592_p2 }
  0x2b   :  { %600 = shalt.err (!%p597_p4)
}
  0x2c   :  { %s601_s25 = scalar_lea.vmem %s50_s26, 4096  ;;  %p606_p6 = scmp.lt.s32.totalorder %s50_s26, %s50_s26 }
  0x2d   :  { %p602_p5 = scmp.ne.s32.totalorder %s50_s26, %s601_s25  ;;  %p607_p7 = scmp.lt.s32.totalorder %s601_s25, %s601_s25 }
  0x2f   :  { %p608_p8 = por %p607_p7, %p606_p6 }
  0x31   :  { %p609_p9 = pnand %p608_p8, %p602_p5 }
  0x33   :  { %612 = shalt.err (!%p609_p9)
}
  0x34   :  { %55 = dma.hbm_to_vmem [thread:$0]  %s925_s3, 4096, %s50_s26, [#allocation6], %s734_s19, %s734_s19, %s735_s20  }
  0x35   :  { %723 = dma.done.wait [#allocation3], 256  }
  0x36   :  { %724 = vsyncadd [#allocation3], 4294967040 }
  0x37   :  { %725 = dma.done.wait [#allocation6], 12288  }
  0x38   :  { %726 = vsyncadd [#allocation6], 4294955008  ;;  %v836_v0 = vld [vmem:[#allocation2] sm:$0xff]  ;;  %v838_v1 = vld [vmem:[#allocation2 + $0x8] sm:$0xff]  ;;  %s739_s26 = smov [#allocation9]   ;;  %s740_s28 = smov [#allocation12]  }
  0x39   :  { %v81_v2 = vld [vmem:[#allocation5 + $0x8] sm:$0xff]  ;;  %v69_v3 = vmul.f32 %v836_v0, %v836_v0  ;;  %v70_v4 = vmul.f32 %v838_v1, %v838_v1  ;;  %v83_v5 = vld [vmem:[#allocation5 + $0x18] sm:$0xff]  ;;  %v80_v6 = vld [vmem:[#allocation5] sm:$0xff]  ;;  %s380_s27 = sshll.u32 %s739_s26, 4  ;;  %s381_s27 = int_to_ptr.vmem [resolvable:$true] %s380_s27 }
  0x3a   :  { %v82_v7 = vld [vmem:[#allocation5 + $0x10] sm:$0xff]  ;;  %v434_v8 = vpack.c.bf16 %v83_v5, %v81_v2  ;;  %v85_v10 = vld [vmem:[#allocation5 + $0x28] sm:$0xff]  ;;  %v87_v11 = vld [vmem:[#allocation5 + $0x38] sm:$0xff]  ;;  %s613_s29 = scalar_lea.vmem %s381_s27, 128  ;;  %p618_p11 = scmp.lt.s32.totalorder %s381_s27, %s381_s27 }
  0x3b   :  { %v436_v9 = vpack.c.bf16 %v82_v7, %v80_v6  ;;  %v84_v12 = vld [vmem:[#allocation5 + $0x20] sm:$0xff]  ;;  %v71_v13 = vadd.f32 %v70_v4, %v69_v3  ;;  %v438_v14 = vpack.c.bf16 %v87_v11, %v85_v10  ;;  %v86_v15 = vld [vmem:[#allocation5 + $0x30] sm:$0xff]  ;;  %v89_v16 = vld [vmem:[#allocation5 + $0x48] sm:$0xff]  ;;  %p614_p10 = scmp.ne.s32.totalorder %s381_s27, %s613_s29  ;;  %p619_p12 = scmp.lt.s32.totalorder %s613_s29, %s613_s29 }
  0x3c   :  { %v91_v17 = vld [vmem:[#allocation5 + $0x58] sm:$0xff]  ;;  %435 = vmatprep.subr.bf16.mxu0 %v434_v8  ;;  %v440_v18 = vpack.c.bf16 %v86_v15, %v84_v12  ;;  %v88_v20 = vld [vmem:[#allocation5 + $0x40] sm:$0xff]  ;;  %v90_v21 = vld [vmem:[#allocation5 + $0x50] sm:$0xff] }
  0x3d   :  { %72 = vadd.xlane.f32.xlu0 %v71_v13  ;;  %437 = vmatpush1.bf16.msra.mxu0 %v436_v9  ;;  %v442_v19 = vpack.c.bf16 %v91_v17, %v89_v16  ;;  %v93_v22 = vld [vmem:[#allocation5 + $0x68] sm:$0xff]  ;;  %v95_v23 = vld [vmem:[#allocation5 + $0x78] sm:$0xff]  ;;  %v444_v24 = vpack.c.bf16 %v90_v21, %v88_v20  ;;  %v92_v26 = vld [vmem:[#allocation5 + $0x60] sm:$0xff]  ;;  %p620_p13 = por %p619_p12, %p618_p11 }
  0x3e   :  { %439 = vmatprep.subr.bf16.mxu0 %v438_v14  ;;  %v446_v25 = vpack.c.bf16 %v95_v23, %v93_v22  ;;  %v94_v27 = vld [vmem:[#allocation5 + $0x70] sm:$0xff]  ;;  %v97_v28 = vld [vmem:[#allocation5 + $0x88] sm:$0xff]  ;;  %v99_v29 = vld [vmem:[#allocation5 + $0x98] sm:$0xff] }
  0x3f   :  { %v448_v30 = vpack.c.bf16 %v94_v27, %v92_v26  ;;  %v450_v31 = vpack.c.bf16 %v99_v29, %v97_v28  ;;  %v96_v32 = vld [vmem:[#allocation5 + $0x80] sm:$0xff]  ;;  %v98_v33 = vld [vmem:[#allocation5 + $0x90] sm:$0xff]  ;;  %v101_v34 = vld [vmem:[#allocation5 + $0xa8] sm:$0xff]  ;;  %p621_p0 = pnand %p620_p13, %p614_p10 }
  0x40   :  { %v103_v35 = vld [vmem:[#allocation5 + $0xb8] sm:$0xff]  ;;  %v452_v36 = vpack.c.bf16 %v98_v33, %v96_v32  ;;  %v100_v38 = vld [vmem:[#allocation5 + $0xa0] sm:$0xff]  ;;  %v102_v39 = vld [vmem:[#allocation5 + $0xb0] sm:$0xff] }
  0x41   :  { %441 = vmatpush1.bf16.msra.mxu0 %v440_v18  ;;  %v454_v37 = vpack.c.bf16 %v103_v35, %v101_v34  ;;  %v105_v40 = vld [vmem:[#allocation5 + $0xc8] sm:$0xff]  ;;  %v107_v41 = vld [vmem:[#allocation5 + $0xd8] sm:$0xff]  ;;  %v456_v42 = vpack.c.bf16 %v102_v39, %v100_v38  ;;  %v104_v44 = vld [vmem:[#allocation5 + $0xc0] sm:$0xff] }
  0x42   :  { %443 = vmatprep.subr.bf16.mxu0 %v442_v19  ;;  %v458_v43 = vpack.c.bf16 %v107_v41, %v105_v40  ;;  %v106_v45 = vld [vmem:[#allocation5 + $0xd0] sm:$0xff]  ;;  %v109_v46 = vld [vmem:[#allocation5 + $0xe8] sm:$0xff]  ;;  %v111_v47 = vld [vmem:[#allocation5 + $0xf8] sm:$0xff] }
  0x43   :  { %v460_v48 = vpack.c.bf16 %v106_v45, %v104_v44  ;;  %v462_v49 = vpack.c.bf16 %v111_v47, %v109_v46  ;;  %v108_v50 = vld [vmem:[#allocation5 + $0xe0] sm:$0xff]  ;;  %v110_v51 = vld [vmem:[#allocation5 + $0xf0] sm:$0xff]  ;;  %v113_v52 = vld [vmem:[#allocation5 + $0x108] sm:$0xff] }
  0x44   :  { %v115_v53 = vld [vmem:[#allocation5 + $0x118] sm:$0xff]  ;;  %v464_v54 = vpack.c.bf16 %v110_v51, %v108_v50  ;;  %v112_v56 = vld [vmem:[#allocation5 + $0x100] sm:$0xff]  ;;  %v114_v57 = vld [vmem:[#allocation5 + $0x110] sm:$0xff] }
  0x45   :  { %445 = vmatpush1.bf16.msra.mxu0 %v444_v24  ;;  %v466_v55 = vpack.c.bf16 %v115_v53, %v113_v52  ;;  %v117_v58 = vld [vmem:[#allocation5 + $0x128] sm:$0xff]  ;;  %v119_v59 = vld [vmem:[#allocation5 + $0x138] sm:$0xff]  ;;  %v468_v60 = vpack.c.bf16 %v114_v57, %v112_v56  ;;  %v116_v62 = vld [vmem:[#allocation5 + $0x120] sm:$0xff] }
  0x46   :  { %447 = vmatprep.subr.bf16.mxu0 %v446_v25  ;;  %v470_v61 = vpack.c.bf16 %v119_v59, %v117_v58  ;;  %v118_v63 = vld [vmem:[#allocation5 + $0x130] sm:$0xff]  ;;  %v121_v2 = vld [vmem:[#allocation5 + $0x148] sm:$0xff]  ;;  %v123_v3 = vld [vmem:[#allocation5 + $0x158] sm:$0xff] }
  0x47   :  { %v472_v4 = vpack.c.bf16 %v118_v63, %v116_v62  ;;  %v474_v5 = vpack.c.bf16 %v123_v3, %v121_v2  ;;  %v120_v6 = vld [vmem:[#allocation5 + $0x140] sm:$0xff]  ;;  %v122_v7 = vld [vmem:[#allocation5 + $0x150] sm:$0xff]  ;;  %v125_v8 = vld [vmem:[#allocation5 + $0x168] sm:$0xff] }
  0x48   :  { %v127_v9 = vld [vmem:[#allocation5 + $0x178] sm:$0xff]  ;;  %v476_v10 = vpack.c.bf16 %v122_v7, %v120_v6  ;;  %v124_v12 = vld [vmem:[#allocation5 + $0x160] sm:$0xff]  ;;  %v126_v13 = vld [vmem:[#allocation5 + $0x170] sm:$0xff]  ;;  %v146_v7 = vlaneseq }
  0x49   :  { %449 = vmatpush1.bf16.msra.mxu0 %v448_v30  ;;  %v478_v11 = vpack.c.bf16 %v127_v9, %v125_v8  ;;  %v129_v14 = vld [vmem:[#allocation5 + $0x188] sm:$0xff]  ;;  %v131_v15 = vld [vmem:[#allocation5 + $0x198] sm:$0xff]  ;;  %v480_v16 = vpack.c.bf16 %v126_v13, %v124_v12  ;;  %v128_v18 = vld [vmem:[#allocation5 + $0x180] sm:$0xff] }
  0x4a   :  { %451 = vmatprep.subr.bf16.mxu0 %v450_v31  ;;  %v482_v17 = vpack.c.bf16 %v131_v15, %v129_v14  ;;  %v130_v19 = vld [vmem:[#allocation5 + $0x190] sm:$0xff]  ;;  %v133_v20 = vld [vmem:[#allocation5 + $0x1a8] sm:$0xff]  ;;  %v135_v21 = vld [vmem:[#allocation5 + $0x1b8] sm:$0xff]  ;;  %v147_v8 = vshrl.u32 %v146_v7, 7 }
  0x4b   :  { %v484_v22 = vpack.c.bf16 %v130_v19, %v128_v18  ;;  %v486_v23 = vpack.c.bf16 %v135_v21, %v133_v20  ;;  %v132_v24 = vld [vmem:[#allocation5 + $0x1a0] sm:$0xff]  ;;  %v134_v25 = vld [vmem:[#allocation5 + $0x1b0] sm:$0xff]  ;;  %v137_v26 = vld [vmem:[#allocation5 + $0x1c8] sm:$0xff] }
  0x4c   :  { %v139_v27 = vld [vmem:[#allocation5 + $0x1d8] sm:$0xff]  ;;  %v488_v28 = vpack.c.bf16 %v134_v25, %v132_v24  ;;  %v136_v30 = vld [vmem:[#allocation5 + $0x1c0] sm:$0xff]  ;;  %v138_v31 = vld [vmem:[#allocation5 + $0x1d0] sm:$0xff]  ;;  %v148_v9 = vsub.s32 0, %v147_v8 }
  0x4d   :  { %453 = vmatpush1.bf16.msra.mxu0 %v452_v36  ;;  %v490_v29 = vpack.c.bf16 %v139_v27, %v137_v26  ;;  %v141_v32 = vld [vmem:[#allocation5 + $0x1e8] sm:$0xff]  ;;  %v143_v33 = vld [vmem:[#allocation5 + $0x1f8] sm:$0xff]  ;;  %v492_v34 = vpack.c.bf16 %v138_v31, %v136_v30  ;;  %v140_v36 = vld [vmem:[#allocation5 + $0x1e0] sm:$0xff] }
  0x4e   :  { %455 = vmatprep.subr.bf16.mxu0 %v454_v37  ;;  %v494_v35 = vpack.c.bf16 %v143_v33, %v141_v32  ;;  %v142_v37 = vld [vmem:[#allocation5 + $0x1f0] sm:$0xff]  ;;  %v239_v44 = vld [vmem:[#allocation7 + $0x8] sm:$0xff]  ;;  %v241_v45 = vld [vmem:[#allocation7 + $0x18] sm:$0xff] }
  0x4f   :  { %v496_v38 = vpack.c.bf16 %v142_v37, %v140_v36  ;;  %v238_v46 = vld [vmem:[#allocation7] sm:$0xff]  ;;  %v498_v47 = vpack.c.bf16 %v241_v45, %v239_v44  ;;  %v245_v50 = vld [vmem:[#allocation7 + $0x38] sm:$0xff]  ;;  %v248_v58 = vld [vmem:[#allocation7 + $0x50] sm:$0xff]  ;;  %v738_v37 = vmov 0.0  }
  0x50   :  { %v242_v53 = vld [vmem:[#allocation7 + $0x20] sm:$0xff]  ;;  %v251_v59 = vld [vmem:[#allocation7 + $0x68] sm:$0xff]  ;;  %v252_v2 = vld [vmem:[#allocation7 + $0x70] sm:$0xff]  ;;  %346 = vmatprep.mubr.f32.mxu1 %v738_v37 }
  0x51   :  { %457 = vmatpush1.bf16.msra.mxu0 %v456_v42  ;;  %499 = vmatprep.subr.bf16.mxu1 %v498_v47  ;;  %v246_v57 = vld [vmem:[#allocation7 + $0x40] sm:$0xff]  ;;  %v255_v3 = vld [vmem:[#allocation7 + $0x88] sm:$0xff]  ;;  %v261_v25 = vld [vmem:[#allocation7 + $0xb8] sm:$0xff] }
  0x52   :  { %459 = vmatprep.subr.bf16.mxu0 %v458_v43  ;;  %v250_v63 = vld [vmem:[#allocation7 + $0x60] sm:$0xff]  ;;  %v259_v24 = vld [vmem:[#allocation7 + $0xa8] sm:$0xff]  ;;  %v265_v31 = vld [vmem:[#allocation7 + $0xd8] sm:$0xff] }
  0x53   :  { %v254_v21 = vld [vmem:[#allocation7 + $0x80] sm:$0xff]  ;;  %v518_v26 = vpack.c.bf16 %v261_v25, %v259_v24  ;;  %v263_v30 = vld [vmem:[#allocation7 + $0xc8] sm:$0xff]  ;;  %v269_v36 = vld [vmem:[#allocation7 + $0xf8] sm:$0xff] }
  0x54   :  { %v258_v27 = vld [vmem:[#allocation7 + $0xa0] sm:$0xff]  ;;  %v522_v33 = vpack.c.bf16 %v265_v31, %v263_v30  ;;  %v270_v47 = vld [vmem:[%s926_s4] sm:$0x3]  ;;  %s400_s4 = sshll.u32 %s740_s28, 4  ;;  %s401_s4 = int_to_ptr.vmem [resolvable:$true] %s400_s4 }
  0x55   :  { %461 = vmatpush1.bf16.msra.mxu0 %v460_v48  ;;  %v240_v48 = vld [vmem:[#allocation7 + $0x10] sm:$0xff]  ;;  %v262_v32 = vld [vmem:[#allocation7 + $0xc0] sm:$0xff] }
  0x56   :  { %463 = vmatprep.subr.bf16.mxu0 %v462_v49  ;;  %v243_v49 = vld [vmem:[#allocation7 + $0x28] sm:$0xff]  ;;  %v500_v51 = vpack.c.bf16 %v240_v48, %v238_v46  ;;  %v275_v48 = vrot.slane %v270_v47, %v148_v9 }
  0x57   :  { %v502_v52 = vpack.c.bf16 %v245_v50, %v243_v49 }
  0x58   :  { %501 = vmatpush1.bf16.msra.mxu1 %v500_v51 }
  0x59   :  { %465 = vmatpush1.bf16.msra.mxu0 %v464_v54  ;;  %v244_v54 = vld [vmem:[#allocation7 + $0x30] sm:$0xff]  ;;  %503 = vmatprep.subr.bf16.mxu1 %v502_v52 }
  0x5a   :  { %467 = vmatprep.subr.bf16.mxu0 %v466_v55  ;;  %v247_v55 = vld [vmem:[#allocation7 + $0x48] sm:$0xff] }
  0x5d   :  { %469 = vmatpush1.bf16.msra.mxu0 %v468_v60  ;;  %v253_v60 = vld [vmem:[#allocation7 + $0x78] sm:$0xff] }
  0x5e   :  { %471 = vmatprep.subr.bf16.mxu0 %v470_v61  ;;  %v508_v61 = vpack.c.bf16 %v248_v58, %v246_v57  ;;  %v510_v62 = vpack.c.bf16 %v253_v60, %v251_v59 }
  0x61   :  { %473 = vmatpush1.bf16.msra.mxu0 %v472_v4  ;;  %v257_v4 = vld [vmem:[#allocation7 + $0x98] sm:$0xff] }
  0x62   :  { %475 = vmatprep.subr.bf16.mxu0 %v474_v5  ;;  %v512_v5 = vpack.c.bf16 %v252_v2, %v250_v63  ;;  %v514_v6 = vpack.c.bf16 %v257_v4, %v255_v3 }
  0x65   :  { %477 = vmatpush1.bf16.msra.mxu0 %v476_v10  ;;  %v144_v10 = vld [vmem:[%s924_s2] sm:$0x3] }
  0x66   :  { %479 = vmatprep.subr.bf16.mxu0 %v478_v11  ;;  %v152_v11 = vsub.s32 1, %v147_v8  ;;  %v149_v12 = vrot.slane %v144_v10, %v148_v9 }
  0x68   :  { %v153_v13 = vrot.slane %v144_v10, %v152_v11  ;;  %v279_v49 = vrot.slane %v270_v47, %v152_v11 }
  0x69   :  { %481 = vmatpush1.bf16.msra.mxu0 %v480_v16 }
  0x6a   :  { %483 = vmatprep.subr.bf16.mxu0 %v482_v17 }
  0x6d   :  { %485 = vmatpush1.bf16.msra.mxu0 %v484_v22  ;;  %v256_v22 = vld [vmem:[#allocation7 + $0x90] sm:$0xff] }
  0x6e   :  { %487 = vmatprep.subr.bf16.mxu0 %v486_v23  ;;  %v516_v23 = vpack.c.bf16 %v256_v22, %v254_v21 }
  0x71   :  { %489 = vmatpush1.bf16.msra.mxu0 %v488_v28  ;;  %v260_v28 = vld [vmem:[#allocation7 + $0xb0] sm:$0xff] }
  0x72   :  { %491 = vmatprep.subr.bf16.mxu0 %v490_v29  ;;  %v520_v29 = vpack.c.bf16 %v260_v28, %v258_v27 }
  0x75   :  { %493 = vmatpush1.bf16.msra.mxu0 %v492_v34  ;;  %v264_v34 = vld [vmem:[#allocation7 + $0xd0] sm:$0xff] }
  0x76   :  { %495 = vmatprep.subr.bf16.mxu0 %v494_v35  ;;  %v267_v35 = vld [vmem:[#allocation7 + $0xe8] sm:$0xff] }
  0x79   :  { %497 = vmatpush1.bf16.msra.mxu0 %v496_v38  ;;  %v524_v38 = vpack.c.bf16 %v264_v34, %v262_v32 }
  0xca   :  { %v73_v39 = vpop.xlane.xlu0 %72 }
  0xcb   :  { %v74_v40 = vmax.f32 %v73_v39, 1e-24  ;;  %v526_v39 = vpack.c.bf16 %v269_v36, %v267_v35 }
  0xcd   :  { %541 = vrsqrt.f32 %v74_v40  ;;  %v266_v40 = vld [vmem:[#allocation7 + $0xe0] sm:$0xff] }
  0xd7   :  { %v542_v41 = vpop.eup %541 }
  0xd8   :  { %v77_v42 = vmul.f32 %v542_v41, %v838_v1  ;;  %v76_v43 = vmul.f32 %v542_v41, %v836_v0  ;;  %v249_v1 = vld [vmem:[#allocation7 + $0x58] sm:$0xff]  ;;  %v504_v0 = vpack.c.bf16 %v244_v54, %v242_v53  ;;  %v268_v41 = vld [vmem:[#allocation7 + $0xf0] sm:$0xff] }
  0xd9   :  { %v506_v56 = vpack.c.bf16 %v249_v1, %v247_v55 }
  0xda   :  { %220 = vmatprep.mubr.f32.mxu0 %v77_v42  ;;  %79 = vst [vmem:[#allocation8 + $0x8] sm:$0xff] %v77_v42  ;;  %78 = vst [vmem:[#allocation8] sm:$0xff] %v76_v43  ;;  %505 = vmatpush1.bf16.msra.mxu1 %v504_v0  ;;  %v528_v42 = vpack.c.bf16 %v268_v41, %v266_v40 }
  0xdb   :  { %221 = vmatmul.mubr.f32.vlgmr.msra.gmra.mrb[0].mxu0 %v76_v43  ;;  %507 = vmatprep.subr.bf16.mxu1 %v506_v56 }
  0xde   :  { %509 = vmatpush1.bf16.msra.mxu1 %v508_v61 }
  0xdf   :  { %511 = vmatprep.subr.bf16.mxu1 %v510_v62 }
  0xe2   :  { %513 = vmatpush1.bf16.msra.mxu1 %v512_v5 }
  0xe3   :  { %515 = vmatprep.subr.bf16.mxu1 %v514_v6 }
  0xe6   :  { %517 = vmatpush1.bf16.msra.mxu1 %v516_v23 }
  0xe7   :  { %519 = vmatprep.subr.bf16.mxu1 %v518_v26 }
  0xea   :  { %521 = vmatpush1.bf16.msra.mxu1 %v520_v29 }
  0xeb   :  { %523 = vmatprep.subr.bf16.mxu1 %v522_v33 }
  0xee   :  { %525 = vmatpush1.bf16.msra.mxu1 %v524_v38 }
  0xef   :  { %527 = vmatprep.subr.bf16.mxu1 %v526_v39 }
  0xf2   :  { %529 = vmatpush1.bf16.msra.mxu1 %v528_v42 }
 0x1ae   :  { %v222_v14 = vpop.f32.mrb[0].mxu0 }
 0x1af   :  { %v223_v15 = vadd.f32 %v222_v14, %v149_v12  ;;  %v224_v16 = vpop.f32.mrb[1].mxu0 }
 0x1b0   :  { %v225_v17 = vadd.f32 %v224_v16, %v153_v13 }
 0x1b1   :  { %227 = vst [vmem:[#allocation9] sm:$0xff] %v223_v15 }
 0x1b2   :  { %228 = vst [vmem:[#allocation11] sm:$0xff] %v225_v17  ;;  %v229_v18 = vadd.f32 %v225_v17, %v223_v15 }
 0x1b4   :  { %v230_v19 = vmul.f32 0.5, %v229_v18 }
 0x1b6   :  { %v231_v20 = vmul.f32 %v230_v19, %v230_v19 }
 0x1b8   :  { %232 = vadd.xlane.f32.xlu0 %v231_v20 }
 0x245   :  { %v233_v43 = vpop.xlane.xlu0 %232 }
 0x246   :  { %v234_v44 = vmax.f32 %v233_v43, 1e-24 }
 0x248   :  { %543 = vrsqrt.f32 %v234_v44 }
 0x252   :  { %v544_v45 = vpop.eup %543 }
 0x253   :  { %v236_v46 = vmul.f32 %v544_v45, %v230_v19 }
 0x255   :  { %347 = vmatmul.mubr.f32.vlgmr.msra.gmra.mrb[0].mxu1 %v236_v46  ;;  %237 = vst [vmem:[#allocation12] sm:$0xff] %v236_v46 }
 0x328   :  { %v348_v50 = vpop.f32.mrb[0].mxu1 }
 0x329   :  { %v852_v51 = vadd.f32 %v348_v50, %v275_v48  ;;  %v350_v52 = vpop.f32.mrb[1].mxu1 }
 0x32a   :  { %v854_v53 = vadd.f32 %v350_v52, %v279_v49 }
 0x32b   :  { %v353_v54 = vmul.f32 %v852_v51, %v852_v51 }
 0x32c   :  { %v354_v55 = vmul.f32 %v854_v53, %v854_v53 }
 0x32e   :  { %v355_v1 = vadd.f32 %v354_v55, %v353_v54 }
 0x330   :  { %356 = vadd.xlane.f32.xlu1 %v355_v1 }
 0x331   :  { %624 = shalt.err (!%p621_p0)
}
 0x332   :  { %s625_s12 = scalar_lea.hbm %s928_s6, 128 }
 0x333   :  { %p626_p1 = scmp.ne.s32.totalorder %s928_s6, %s625_s12  ;;  %p629_p2 = scmp.lt.u32.totalorder %s625_s12, %s928_s6 }
 0x335   :  { %p631_p3 = pnand %p629_p2, %p626_p1 }
 0x337   :  { %634 = shalt.err (!%p631_p3)
}
 0x338   :  { %383 = dma.vmem_to_hbm [thread:$0]  %s381_s27, 128, %s928_s6, [#allocation10]  }
 0x339   :  { %s635_s17 = scalar_lea.vmem %s401_s4, 128  ;;  %p640_p5 = scmp.lt.s32.totalorder %s401_s4, %s401_s4 }
 0x33a   :  { %p636_p4 = scmp.ne.s32.totalorder %s401_s4, %s635_s17  ;;  %p641_p6 = scmp.lt.s32.totalorder %s635_s17, %s635_s17 }
 0x33c   :  { %p642_p7 = por %p641_p6, %p640_p5 }
 0x33e   :  { %p643_p8 = pnand %p642_p7, %p636_p4 }
 0x340   :  { %646 = shalt.err (!%p643_p8)
}
 0x341   :  { %s647_s22 = scalar_lea.hbm %s930_s8, 128 }
 0x342   :  { %p648_p9 = scmp.ne.s32.totalorder %s930_s8, %s647_s22  ;;  %p651_p10 = scmp.lt.u32.totalorder %s647_s22, %s930_s8 }
 0x344   :  { %p653_p11 = pnand %p651_p10, %p648_p9 }
 0x346   :  { %656 = shalt.err (!%p653_p11)
}
 0x347   :  { %403 = dma.vmem_to_hbm [thread:$0]  %s401_s4, 128, %s930_s8, [#allocation13]  }
 0x348   :  { %s741_s19 = smov [#allocation8]   ;;  %s742_s20 = smov [#allocation11]  }
 0x349   :  { %s370_s2 = sshll.u32 %s741_s19, 4  ;;  %s390_s26 = sshll.u32 %s742_s20, 4  ;;  %s371_s2 = int_to_ptr.vmem [resolvable:$true] %s370_s2  ;;  %s391_s26 = int_to_ptr.vmem [resolvable:$true] %s390_s26 }
 0x34a   :  { %s657_s27 = scalar_lea.vmem %s371_s2, 256  ;;  %p662_p13 = scmp.lt.s32.totalorder %s371_s2, %s371_s2 }
 0x34b   :  { %p658_p12 = scmp.ne.s32.totalorder %s371_s2, %s657_s27  ;;  %p663_p0 = scmp.lt.s32.totalorder %s657_s27, %s657_s27 }
 0x34d   :  { %p664_p1 = por %p663_p0, %p662_p13 }
 0x34f   :  { %p665_p2 = pnand %p664_p1, %p658_p12 }
 0x351   :  { %668 = shalt.err (!%p665_p2)
}
 0x352   :  { %s669_s30 = scalar_lea.hbm %s927_s5, 256 }
 0x353   :  { %p670_p3 = scmp.ne.s32.totalorder %s927_s5, %s669_s30  ;;  %p673_p4 = scmp.lt.u32.totalorder %s669_s30, %s927_s5 }
 0x355   :  { %p675_p5 = pnand %p673_p4, %p670_p3 }
 0x357   :  { %678 = shalt.err (!%p675_p5)
}
 0x358   :  { %373 = dma.vmem_to_hbm [thread:$0]  %s371_s2, 256, %s927_s5, [#allocation4]  }
 0x359   :  { %s679_s10 = scalar_lea.vmem %s391_s26, 128  ;;  %p684_p7 = scmp.lt.s32.totalorder %s391_s26, %s391_s26 }
 0x35a   :  { %p680_p6 = scmp.ne.s32.totalorder %s391_s26, %s679_s10  ;;  %p685_p8 = scmp.lt.s32.totalorder %s679_s10, %s679_s10 }
 0x35c   :  { %p686_p9 = por %p685_p8, %p684_p7 }
 0x35e   :  { %p687_p10 = pnand %p686_p9, %p680_p6 }
 0x360   :  { %690 = shalt.err (!%p687_p10)
}
 0x361   :  { %s691_s16 = scalar_lea.hbm %s929_s7, 128 }
 0x362   :  { %p692_p11 = scmp.ne.s32.totalorder %s929_s7, %s691_s16  ;;  %p695_p12 = scmp.lt.u32.totalorder %s691_s16, %s929_s7 }
 0x364   :  { %p697_p13 = pnand %p695_p12, %p692_p11 }
 0x366   :  { %700 = shalt.err (!%p697_p13)
}
 0x367   :  { %393 = dma.vmem_to_hbm [thread:$0]  %s391_s26, 128, %s929_s7, [#allocation10]  }
 0x368   :  { %s743_s25 = smov [#allocation14]  }
 0x369   :  { %s410_s0 = sshll.u32 %s743_s25, 4  ;;  %s411_s0 = int_to_ptr.vmem [resolvable:$true] %s410_s0 }
 0x36a   :  { %s701_s24 = scalar_lea.vmem %s411_s0, 256  ;;  %p706_p1 = scmp.lt.s32.totalorder %s411_s0, %s411_s0 }
 0x36b   :  { %p702_p0 = scmp.ne.s32.totalorder %s411_s0, %s701_s24  ;;  %p707_p2 = scmp.lt.s32.totalorder %s701_s24, %s701_s24 }
 0x36d   :  { %p708_p3 = por %p707_p2, %p706_p1 }
 0x36f   :  { %p709_p4 = pnand %p708_p3, %p702_p0 }
 0x3bd   :  { %v357_v0 = vpop.xlane.xlu1 %356 }
 0x3be   :  { %v358_v56 = vmax.f32 %v357_v0, 1e-24 }
 0x3c0   :  { %545 = vrsqrt.f32 %v358_v56 }
 0x3ca   :  { %v546_v57 = vpop.eup %545 }
 0x3cb   :  { %v360_v58 = vmul.f32 %v546_v57, %v852_v51  ;;  %v361_v59 = vmul.f32 %v546_v57, %v854_v53 }
 0x3cd   :  { %362 = vst [vmem:[#allocation14] sm:$0xff] %v360_v58  ;;  %363 = vst [vmem:[#allocation14 + $0x8] sm:$0xff] %v361_v59 }
 0x3ce   :  { %712 = shalt.err (!%p709_p4)
}
 0x3cf   :  { %s713_s3 = scalar_lea.hbm %s931_s9, 256 }
 0x3d0   :  { %p714_p5 = scmp.ne.s32.totalorder %s931_s9, %s713_s3  ;;  %p717_p6 = scmp.lt.u32.totalorder %s713_s3, %s931_s9 }
 0x3d2   :  { %p719_p7 = pnand %p717_p6, %p714_p5 }
 0x3d4   :  { %722 = shalt.err (!%p719_p7)
}
 0x3d5   :  { %413 = dma.vmem_to_hbm [thread:$0]  %s411_s0, 256, %s931_s9, [#allocation13]  }
 0x3d6   :  { %727 = dma.done.wait [#allocation4], 256  }
 0x3d7   :  { %728 = vsyncadd [#allocation4], 4294967040 }
 0x3d8   :  { %729 = dma.done.wait [#allocation10], 256  }
 0x3d9   :  { %730 = vsyncadd [#allocation10], 4294967040 }
 0x3da   :  { %731 = dma.done.wait [#allocation13], 384  }
 0x3db   :  { %732 = vsyncadd [#allocation13], 4294966912 }
 0x3dc   :  { %429 = vsyncpa [#allocation3], 1 }
 0x3dd   :  { %430 = vsyncpa [#allocation6], 1 }
 0x3de   :  { %431 = vsyncpa [#allocation4], 1 }
 0x3df   :  { %432 = vsyncpa [#allocation10], 1 }
 0x3e0   :  { %433 = vsyncpa [#allocation13], 1 }

</bundles_post_ra>
